<compile_context>
chip_gen: v7x
topology: tpu7x:2x2x1
jax: 0.10.0
libtpu: 0.0.40
codegen_flags: <defaults>
</compile_context>

<pallas_src>
import functools

import jax
import jax.numpy as jnp
from jax.experimental import pallas as pl
from jax.experimental.pallas import tpu as pltpu


def _focal_loss_kernel(*refs, gamma, reduction, has_alpha, n_valid, needs_mask):
    if has_alpha:
        logits_ref, targets_ref, alpha_ref, out_ref = refs
    else:
        logits_ref, targets_ref, out_ref = refs
        alpha_ref = None

    i = pl.program_id(0)
    tn = logits_ref.shape[0]

    x = logits_ref[...].astype(jnp.float32)          # (TN, C) upcast in-kernel
    t = targets_ref[...]                             # (TN, 1) int32

    # x[row, target[row]] via an iota compare (no per-row gather).  Done first
    # so the iota / one-hot temporaries are dead before the exp/sum-exp pass.
    col = jax.lax.broadcasted_iota(jnp.int32, x.shape, 1)           # (TN, C)
    x_t = jnp.sum(jnp.where(col == t, x, 0.0), axis=1, keepdims=True)  # (TN,1)

    # log-softmax via log-sum-exp: log_pt = x[target] - lse(x).
    m = jnp.max(x, axis=1, keepdims=True)                    # (TN, 1)
    sumexp = jnp.sum(jnp.exp(x - m), axis=1, keepdims=True)  # (TN, 1)
    log_pt = x_t - (m + jnp.log(sumexp))                     # (TN, 1)
    pt = jnp.exp(log_pt)                                     # (TN, 1)

    if has_alpha:
        # alpha[targets] was pre-gathered in the wrapper -> (TN, 1) column.
        log_pt = log_pt * alpha_ref[...]

    one_m_pt = 1.0 - pt
    if float(gamma).is_integer() and float(gamma) >= 0:
        # Integer gamma: plain VPU multiplies, no exp/log, safe at pt == 1.
        g = int(gamma)
        focal = jnp.ones_like(pt) if g == 0 else one_m_pt
        for _ in range(max(0, g - 1)):
            focal = focal * one_m_pt
    else:
        # Clamp: pt can round to slightly > 1 (lse rounding), and
        # power(negative, fractional) would be NaN.
        focal = jnp.power(jnp.maximum(one_m_pt, 0.0), jnp.float32(gamma))

    loss = -focal * log_pt                                   # (TN, 1)

    if reduction == 'none':
        # Padded remainder rows are sliced off in the wrapper; no masking here.
        out_ref[...] = loss
        return

    # 'mean' / 'sum': each grid step writes its partial sum into its own
    # (8, 128)-aligned block ("parallel" axis -> megacore-safe on v7x); the
    # wrapper performs the tiny final reduction.
    def _store(masked):
        if masked:
            row = i * tn + jax.lax.broadcasted_iota(jnp.int32, loss.shape, 0)
            s = jnp.sum(jnp.where(row < n_valid, loss, 0.0))
        else:
            s = jnp.sum(loss)
        out_ref[...] = jnp.full(out_ref.shape, s, dtype=out_ref.dtype)

    if needs_mask:
        last = pl.num_programs(0) - 1

        @pl.when(i != last)
        def _():
            _store(False)

        @pl.when(i == last)
        def _():
            _store(True)
    else:
        _store(False)


def _vmem_params():
    """(vmem_limit_bytes, tile_budget_bytes) derived from the local chip."""
    cap = 64 * 1024 * 1024                        # conservative default (v7x)
    try:
        info = pltpu.get_tpu_info()
        cap = int(getattr(info, "vmem_capacity_bytes", cap)) or cap
    except Exception:
        pass
    vmem_limit = (cap * 3) // 4                   # 48 MiB v7x, 96 MiB v5e/v6e
    tile_budget = (vmem_limit * 3) // 4           # headroom under the limit
    return vmem_limit, tile_budget


def _choose_tile_rows(n, c, itemsize, tile_budget):
    """Rows per tile from an honest VMEM estimate + a >=4 MiB HBM/step target."""
    c_lanes = -(-c // 128) * 128                  # lane padding of the class dim
    per_row = (2 * c_lanes * itemsize             # logits, double-buffered
               + 3 * 2 * 128 * 4                  # targets / alpha / out columns
               + 4 * c_lanes * 4)                 # ~4 live f32 body temporaries
    tn_vmem = max(8, tile_budget // per_row)
    # HBM-side target: >= 4 MiB of logits per grid step amortizes the
    # ~0.35 us fixed per-step overhead and keeps the DMA pipeline busy.
    tn_hbm = max(512, (4 * 1024 * 1024) // max(1, c * itemsize))
    tn = min(tn_vmem, tn_hbm)
    n_pad8 = -(-n // 8) * 8
    tn = min(tn, n_pad8)
    return max(8, (tn // 8) * 8)


def focal_loss(logits, targets, gamma=2.0, alpha=None, reduction='mean',
               tile_rows=None):
    """Pallas implementation of FocalLoss.forward(inputs, targets)."""
    N, C = logits.shape
    has_alpha = alpha is not None
    targets = targets.astype(jnp.int32)
    if reduction not in ('mean', 'sum'):
        reduction = 'none'                        # matches the PyTorch else-branch

    vmem_limit, tile_budget = _vmem_params()
    itemsize = jnp.dtype(logits.dtype).itemsize
    tn = tile_rows if tile_rows is not None else _choose_tile_rows(
        N, C, itemsize, tile_budget)
    tn = max(8, int(tn) // 8 * 8)
    grid_n = pl.cdiv(N, tn)
    n_pad = grid_n * tn
    needs_mask = (n_pad != N) and (reduction != 'none')

    # Keep the input dtype through HBM->VMEM (bf16 stays bf16); pad N only.
    logits_p = logits if n_pad == N else jnp.pad(logits,
                                                 ((0, n_pad - N), (0, 0)))
    targets_p = targets.reshape(N, 1)
    if n_pad != N:
        targets_p = jnp.pad(targets_p, ((0, n_pad - N), (0, 0)))

    in_arrays = [logits_p, targets_p]
    in_specs = [
        pl.BlockSpec((tn, C), lambda i: (i, 0)),   # logits row tile
        pl.BlockSpec((tn, 1), lambda i: (i, 0)),   # targets row tile
    ]
    if has_alpha:
        # Pre-gather alpha[targets] into a column; DMA'd as a (tn, 1) block.
        at = jnp.asarray(alpha, jnp.float32)[targets].reshape(N, 1)
        if n_pad != N:
            at = jnp.pad(at, ((0, n_pad - N), (0, 0)))
        in_arrays.append(at)
        in_specs.append(pl.BlockSpec((tn, 1), lambda i: (i, 0)))

    if reduction in ('mean', 'sum'):
        # Per-tile partial sums in disjoint (8,128) blocks -> 'parallel' axis.
        out_shape = jax.ShapeDtypeStruct((grid_n * 8, 128), jnp.float32)
        out_spec = pl.BlockSpec((8, 128), lambda i: (i, 0))
    else:  # 'none'
        out_shape = jax.ShapeDtypeStruct((n_pad, 1), jnp.float32)
        out_spec = pl.BlockSpec((tn, 1), lambda i: (i, 0))

    kernel = functools.partial(
        _focal_loss_kernel, gamma=float(gamma), reduction=reduction,
        has_alpha=has_alpha, n_valid=N, needs_mask=needs_mask)

    out = pl.pallas_call(
        kernel,
        out_shape=out_shape,
        grid=(grid_n,),
        in_specs=in_specs,
        out_specs=out_spec,
        compiler_params=pltpu.CompilerParams(
            dimension_semantics=("parallel",),   # rows / tiles are independent
            vmem_limit_bytes=vmem_limit),
    )(*in_arrays)

    if reduction in ('mean', 'sum'):
        partials = out[0::8, 0]                  # one partial per grid step
        total = jnp.sum(partials)
        return total / N if reduction == 'mean' else total
    return out[:N, 0]


def _focal_loss_ref(logits, targets, gamma=2.0, alpha=None, reduction='mean'):
    """Pure-JAX reference mirroring the PyTorch module exactly."""
    probs = jax.nn.softmax(logits.astype(jnp.float32), axis=1)
    pt = probs[jnp.arange(probs.shape[0]), targets]
    log_pt = jnp.log(pt)
    if alpha is not None:
        log_pt = log_pt * jnp.asarray(alpha, jnp.float32)[targets]
    loss = -(1.0 - pt) ** gamma * log_pt
    if reduction == 'mean':
        return loss.mean()
    elif reduction == 'sum':
        return loss.sum()
    return loss


if __name__ == "__main__":
    key = jax.random.PRNGKey(0)
    k_logits, k_targets, k_alpha = jax.random.split(key, 3)

    N, C = 13, 32  # 13 examples, 32 classes (N not a multiple of 8 -> padding)
    logits = jax.random.normal(k_logits, (N, C), dtype=jnp.float32)
    targets = jax.random.randint(k_targets, (N,), 0, C, dtype=jnp.int32)
    alpha = jax.random.uniform(k_alpha, (C,), dtype=jnp.float32,
                               minval=0.25, maxval=1.0)

    # Default module config (gamma=2, alpha=None) over all reductions.
    # tile_rows=8 forces a 2-step grid (partial sums + last-tile masking).
    for reduction in ('mean', 'sum', 'none'):
        out = jax.block_until_ready(
            focal_loss(logits, targets, gamma=2.0, alpha=None,
                       reduction=reduction, tile_rows=8))
        ref = _focal_loss_ref(logits, targets, 2.0, None, reduction)
        assert jnp.allclose(out, ref, rtol=1e-5, atol=1e-5), (reduction, out, ref)

    # Per-class alpha weights, auto tile size (single tile).
    out = jax.block_until_ready(
        focal_loss(logits, targets, gamma=2.0, alpha=alpha, reduction='mean'))
    ref = _focal_loss_ref(logits, targets, 2.0, alpha, 'mean')
    assert jnp.allclose(out, ref, rtol=1e-5, atol=1e-5), (out, ref)

    # Non-integer gamma exercises the clamped jnp.power path.
    out = jax.block_until_ready(
        focal_loss(logits, targets, gamma=1.5, alpha=None, reduction='sum',
                   tile_rows=8))
    ref = _focal_loss_ref(logits, targets, 1.5, None, 'sum')
    assert jnp.allclose(out, ref, rtol=1e-5, atol=1e-5), (out, ref)

    # Batch already a multiple of the tile -> unmasked partial-sum path.
    N2 = 16
    logits2 = jax.random.normal(k_logits, (N2, C), dtype=jnp.float32)
    targets2 = jax.random.randint(k_targets, (N2,), 0, C, dtype=jnp.int32)
    out = jax.block_until_ready(
        focal_loss(logits2, targets2, gamma=2.0, alpha=None, reduction='mean',
                   tile_rows=8))
    ref = _focal_loss_ref(logits2, targets2, 2.0, None, 'mean')
    assert jnp.allclose(out, ref, rtol=1e-5, atol=1e-5), (out, ref)

    print("KERNEL_OK")
</pallas_src>

<mosaic_0001>
module attributes {stable_mosaic.version = 11 : i64} {
  func.func @_focal_loss_kernel(%arg0: i32, %arg1: memref<8x32xf32, #tpu.memory_space<vmem>>, %arg2: memref<8x1xi32, #tpu.memory_space<vmem>>, %arg3: memref<8x128xf32, #tpu.memory_space<vmem>>) attributes {dimension_semantics = [#tpu.dimension_semantics<parallel>], iteration_bounds = array<i64: 2>, scalar_prefetch = 0 : i64, scratch_operands = 0 : i64, tpu.core_type = #tpu.core_type<tc>, window_params = [{transform_indices = @transform_0, window_bounds = array<i64: 8, 32>}, {transform_indices = @transform_1, window_bounds = array<i64: 8, 1>}, {transform_indices = @transform_2, window_bounds = array<i64: 8, 128>}]} {
    %c0 = arith.constant 0 : index
    %c0_0 = arith.constant 0 : index
    %0 = vector.load %arg1[%c0, %c0_0] : memref<8x32xf32, #tpu.memory_space<vmem>>, vector<8x32xf32>
    %c0_1 = arith.constant 0 : index
    %c0_2 = arith.constant 0 : index
    %1 = vector.load %arg2[%c0_1, %c0_2] : memref<8x1xi32, #tpu.memory_space<vmem>>, vector<8x1xi32>
    %2 = tpu.iota {dimensions = array<i32: 1>} : vector<8x32xi32>
    %3 = vector.broadcast %1 : vector<8x1xi32> to vector<8x32xi32>
    %4 = arith.cmpi eq, %2, %3 : vector<8x32xi32>
    %cst = arith.constant 0.000000e+00 : f32
    %5 = vector.broadcast %cst : f32 to vector<8x32xf32>
    %6 = arith.select %4, %0, %5 : vector<8x32xi1>, vector<8x32xf32>
    %cst_3 = arith.constant dense<0.000000e+00> : vector<8xf32>
    %7 = vector.multi_reduction <add>, %6, %cst_3 [1] : vector<8x32xf32> to vector<8xf32>
    %8 = vector.shape_cast %7 : vector<8xf32> to vector<8x1xf32>
    %cst_4 = arith.constant dense<0xFF800000> : vector<8xf32>
    %9 = vector.multi_reduction <maximumf>, %0, %cst_4 [1] : vector<8x32xf32> to vector<8xf32>
    %10 = vector.shape_cast %9 : vector<8xf32> to vector<8x1xf32>
    %11 = vector.broadcast %10 : vector<8x1xf32> to vector<8x32xf32>
    %12 = arith.subf %0, %11 : vector<8x32xf32>
    %13 = math.exp %12 : vector<8x32xf32>
    %cst_5 = arith.constant dense<0.000000e+00> : vector<8xf32>
    %14 = vector.multi_reduction <add>, %13, %cst_5 [1] : vector<8x32xf32> to vector<8xf32>
    %15 = vector.shape_cast %14 : vector<8xf32> to vector<8x1xf32>
    %16 = math.log %15 : vector<8x1xf32>
    %17 = arith.addf %10, %16 : vector<8x1xf32>
    %18 = arith.subf %8, %17 : vector<8x1xf32>
    %19 = math.exp %18 : vector<8x1xf32>
    %cst_6 = arith.constant 1.000000e+00 : f32
    %20 = vector.broadcast %cst_6 : f32 to vector<8x1xf32>
    %21 = arith.subf %20, %19 : vector<8x1xf32>
    %22 = arith.mulf %21, %21 : vector<8x1xf32>
    %cst_7 = arith.constant 0.000000e+00 : f32
    %23 = vector.broadcast %cst_7 : f32 to vector<8x1xf32>
    %24 = arith.subf %23, %22 : vector<8x1xf32>
    %25 = arith.mulf %24, %18 : vector<8x1xf32>
    %c1_i32 = arith.constant 1 : i32
    %26 = arith.cmpi ne, %arg0, %c1_i32 : i32
    %27 = arith.extui %26 : i1 to i32
    %c0_i32 = arith.constant 0 : i32
    %28 = arith.cmpi ne, %27, %c0_i32 : i32
    scf.if %28 {
      %32 = vector.shape_cast %25 : vector<8x1xf32> to vector<1x8x1xf32>
      %cst_10 = arith.constant dense<0.000000e+00> : vector<1xf32>
      %33 = vector.multi_reduction <add>, %32, %cst_10 [1, 2] : vector<1x8x1xf32> to vector<1xf32>
      %34 = vector.shape_cast %33 : vector<1xf32> to vector<1x1x1xf32>
      %35 = vector.extract %34[0, 0, 0] : f32 from vector<1x1x1xf32>
      %36 = vector.broadcast %35 : f32 to vector<8x128xf32>
      %c0_11 = arith.constant 0 : index
      %c0_12 = arith.constant 0 : index
      %37 = vector.load %arg3[%c0_11, %c0_12] : memref<8x128xf32, #tpu.memory_space<vmem>>, vector<8x128xf32>
      tpu.vector_store %arg3[%c0_11, %c0_12], %36 {strides = array<i32>} : memref<8x128xf32, #tpu.memory_space<vmem>>, vector<8x128xf32>,
    } else {
    }
    %c1_i32_8 = arith.constant 1 : i32
    %29 = arith.cmpi eq, %arg0, %c1_i32_8 : i32
    %30 = arith.extui %29 : i1 to i32
    %c0_i32_9 = arith.constant 0 : i32
    %31 = arith.cmpi ne, %30, %c0_i32_9 : i32
    scf.if %31 {
      %c8_i32 = arith.constant 8 : i32
      %32 = arith.muli %arg0, %c8_i32 : i32
      %33 = tpu.iota {dimensions = array<i32: 0>} : vector<8x1xi32>
      %34 = vector.broadcast %32 : i32 to vector<8x1xi32>
      %35 = arith.addi %34, %33 : vector<8x1xi32>
      %c13_i32 = arith.constant 13 : i32
      %36 = vector.broadcast %c13_i32 : i32 to vector<8x1xi32>
      %37 = arith.cmpi slt, %35, %36 : vector<8x1xi32>
      %cst_10 = arith.constant 0.000000e+00 : f32
      %38 = vector.broadcast %cst_10 : f32 to vector<8x1xf32>
      %39 = arith.select %37, %25, %38 : vector<8x1xi1>, vector<8x1xf32>
      %40 = vector.shape_cast %39 : vector<8x1xf32> to vector<1x8x1xf32>
      %cst_11 = arith.constant dense<0.000000e+00> : vector<1xf32>
      %41 = vector.multi_reduction <add>, %40, %cst_11 [1, 2] : vector<1x8x1xf32> to vector<1xf32>
      %42 = vector.shape_cast %41 : vector<1xf32> to vector<1x1x1xf32>
      %43 = vector.extract %42[0, 0, 0] : f32 from vector<1x1x1xf32>
      %44 = vector.broadcast %43 : f32 to vector<8x128xf32>
      %c0_12 = arith.constant 0 : index
      %c0_13 = arith.constant 0 : index
      %45 = vector.load %arg3[%c0_12, %c0_13] : memref<8x128xf32, #tpu.memory_space<vmem>>, vector<8x128xf32>
      tpu.vector_store %arg3[%c0_12, %c0_13], %44 {strides = array<i32>} : memref<8x128xf32, #tpu.memory_space<vmem>>, vector<8x128xf32>,
    } else {
    }
    return
  }
  func.func @transform_0(%arg0: i32) -> (i32, i32) {
    %c0_i32 = arith.constant 0 : i32
    %c0_i32_0 = arith.constant 0 : i32
    return %arg0, %c0_i32 : i32, i32
  }
  func.func @transform_1(%arg0: i32) -> (i32, i32) {
    %c0_i32 = arith.constant 0 : i32
    %c0_i32_0 = arith.constant 0 : i32
    return %arg0, %c0_i32 : i32, i32
  }
  func.func @transform_2(%arg0: i32) -> (i32, i32) {
    %c0_i32 = arith.constant 0 : i32
    %c0_i32_0 = arith.constant 0 : i32
    return %arg0, %c0_i32 : i32, i32
  }
}

</mosaic_0001>

<bundles_post_ra>
// kernel: tpu_custom_call.1
= control target key start
LH: loop header
LB: loop body
LE: loop exit
PB: predicated region body
PF: predicated region fallthrough
CT: control target
= control target key end

     0   :  { %7 = vsyncpa [#allocation3], 0  ;;  %s575_s0 = inlined_call_operand.vmem [shape: f32[16,32], index: 0, kind: input, shape index: {}]   ;;  %s576_s1 = inlined_call_operand.vmem [shape: s32[16,1], index: 1, kind: input, shape index: {}]   ;;  %s577_s2 = inlined_call_operand.hbm [shape: f32[16,128], index: 2, kind: output, shape index: {}]  }
   0x1   :  { %9 = vsyncpa [#allocation3 + $0x1], 0  ;;  %s460_s9 = smov 0   ;;  %s462_s10 = smov 0  }
   0x2   :  { %s464_s11 = smov 0   ;;  %s466_s12 = smov 0  }
   0x3 LB: > { %s481_s13 = sadd.s32 4294967295, %s441_s12   ;;  %s314_s14 = sadd.s32 4294967294, %s441_s12   ;;  %s441_s12 = sphi %s466_s12, %s583_s12   ;;  %s437_s11 = sphi %s464_s11, %s582_s11   ;;  %s433_s10 = sphi %s462_s10, %s581_s10   ;;  %s429_s9 = sphi %s460_s9, %s580_s9  }
   0x4   : > { %s485_s15 = sadd.s32 1, %s441_s12   ;;  %s74_s16 = sadd.s32 1, %s437_s11 }
   0x5   : > { %s71_s17 = ssub.s32 %s441_s12, %s485_s15  ;;  %p84_p0 = scmp.ne.s32.totalorder %s437_s11, %s433_s10 }
   0x6   : > { %p72_p1 = scmp.eq.s32.totalorder %s71_s17, 0  ;;  %p85_p2 = scmp.eq.s32.totalorder %s481_s13, 1 }
   0x7   : > { %p90_p3 = scmp.ne.s32.totalorder %s433_s10, %s429_s9  ;;  %p91_p4 = scmp.eq.s32.totalorder %s314_s14, 1 }
   0x8   : > { %s496_s18 = scalar_select %p72_p1, %s437_s11, %s74_s16  }
   0x9   : > { %p500_p5 = por %p85_p2, %p84_p0  ;;  %p504_p6 = por %p91_p4, %p90_p3 }
   0xa   : > { %p317_p7 = scmp.ge.s32.totalorder %s441_s12, 1  ;;  %p123_p8 = scmp.lt.s32.totalorder %s441_s12, 3 }
   0xc   : > { %p124_p9 = pnand %p317_p7, %p123_p8 }
   0xd   : > { %p148_p10 = scmp.lt.s32.totalorder (!%p124_p9), %s481_s13, 1  ;;  %v443_v0 = vmov (!%p124_p9), 0   ;;  %vm165_vm0 = vcmask (!%p124_p9), 261120   ;;  %v158_v7 = vlaneseq (!%p124_p9)  ;;  %s145_s29 = sand.u32 (!%p124_p9), 1, %s433_s10  }
   0xe   : > { %127 = sbr.rel (%p124_p9) target bundleno = 810 (0x32a), region = 28  ;;  %372 = vset.pattern.permute.xlu0 (!%p124_p9), %v443_v0  ;;  %s318_s30 = sshll.u32 (!%p124_p9), %s145_s29, 3 }
   0xf   : > { %v159_v8 = vand.u32 (!%p124_p9), 127, %v158_v7  ;;  %s524_s3 = scalar_lea.vmem (!%p124_p9), [#allocation2], %s318_s30 }
  0x15   : > { %s149_s21 = scalar_select %p148_p10, %s481_s13, 1 }
  0x16   : > { %vm192_vm2 = vcmask (!%p85_p2), 7168  }
  0x17   : > { %s319_s22 = sshll.u32 %s149_s21, 3 }
  0x18   : > { %s151_s25 = scalar_lea.vmem %s575_s0, %s319_s22  ;;  %s155_s28 = scalar_lea.vmem %s576_s1, %s319_s22 }
  0x19   : > { %v156_v1 = vld [vmem:[%s151_s25] sm:$0xff] }
  0x1a   : > { %v169_v2 = vsel %vm165_vm0, %v156_v1, -inf  ;;  %v157_v3 = vld [vmem:[%s155_s28] sm:$0xff] }
  0x1b   : > { %170 = vmax.xlane.f32.xlu0 %v169_v2 }
  0x31   : > { %161 = vperm.xlu0 %372, %v157_v3  }
  0xa8   : > { %v171_v4 = vpop.xlane.xlu0 %170 }
  0xa9   : > { %v172_v5 = vsub.f32 %v156_v1, %v171_v4 }
  0xab   : > { %v173_v6 = vmul.f32 1.442695, %v172_v5 }
  0xad   : > { %373 = vpow2.f32 %v173_v6 }
  0xb0   : > { %v162_v9 = vpop.permute.xlu0 %161 }
  0xb1   : > { %vm163_vm1 = vcmp.eq.s32.totalorder %v159_v8, %v162_v9 }
  0xb2   : > { %v164_v11 = vsel %vm163_vm1, %v156_v1, 0.0 }
  0xb3   : > { %v166_v13 = vsel %vm165_vm0, %v164_v11, 0.0 }
  0xb7   : > { %v374_v10 = vpop.eup %373 }
  0xb8   : > { %v175_v12 = vsel %vm165_vm0, %v374_v10, 0.0 }
  0xb9   : > { %176 = vadd.xlane.f32.xlu1 %v175_v12 }
  0xbd   : > { %167 = vadd.xlane.f32.xlu1 %v166_v13 }
 0x146   : > { %v177_v14 = vpop.xlane.xlu1 %176 }
 0x147   : > { %375 = vlog2.f32 %v177_v14 }
 0x14a   : > { %v168_v17 = vpop.xlane.xlu1 %167 }
 0x151   : > { %v376_v15 = vpop.eup %375 }
 0x152   : > { %v179_v16 = vmul.f32 0.6931472, %v376_v15 }
 0x154   : > { %v180_v18 = vadd.f32 %v179_v16, %v171_v4 }
 0x156   : > { %v181_v19 = vsub.f32 %v168_v17, %v180_v18 }
 0x158   : > { %v182_v20 = vmul.f32 1.442695, %v181_v19 }
 0x15a   : > { %377 = vpow2.f32 %v182_v20 }
 0x164   : > { %v378_v21 = vpop.eup %377 }
 0x165   : > { %v184_v22 = vsub.f32 1.0, %v378_v21  ;;  %191 = sbr.rel (%p85_p2) target bundleno = 572 (0x23c), region = 32 }
 0x167   : > { %v185_v23 = vmul.f32 %v184_v22, %v184_v22 }
 0x169   : > { %v186_v24 = vsub.f32 0.0, %v185_v23 }
 0x16b   : > { %v187_v25 = vmul.f32 %v186_v24, %v181_v19 }
 0x16d   : > { %v193_v26 = vsel %vm192_vm2, %v187_v25, 0.0 }
 0x16e   : > { %194 = vadd.xlane.f32.xlu0 %v193_v26 }
 0x1fb   : > { %v195_v27 = vpop.xlane.xlu0 %194 }
 0x1fc   : > { %v196_v28 = vrot.slane %v195_v27, 4 }
 0x1fe   : > { %v197_v29 = vadd.f32 %v196_v28, %v195_v27 }
 0x200   : > { %v198_v30 = vrot.slane %v197_v29, 2 }
 0x202   : > { %v199_v31 = vadd.f32 %v198_v30, %v197_v29 }
 0x204   : > { %v200_v32 = vrot.slane %v199_v31, 1 }
 0x206   : > { %v201_v33 = vadd.f32 %v200_v32, %v199_v31 }
 0x208   : > { %328 = vpush %v201_v33 }
 0x239   : > { %s329_s4 = spop %328 }
 0x23a   : > { %v203_v34 = vstv %s329_s4 }
 0x23b   : > { %204 = vst [vmem:[%s524_s3] sm:$0xff] %v203_v34 }
 0x23c PF: > { %p322_p11 = scmp.ne.s32.totalorder %s481_s13, 1 }
 0x23d   : > { %s323_s5 = sshll.u32 (!%p322_p11), %s481_s13, 3  ;;  %v211_v35 = vshrl.u32 (!%p322_p11), %v158_v7, 7  ;;  %vm216_vm3 = vcmask (!%p322_p11), 7168  }
 0x23e   : > { %208 = sbr.rel (%p322_p11) target bundleno = 786 (0x312), region = 36  ;;  %v212_v36 = vstv (!%p322_p11), %s323_s5 }
 0x23f   : > { %v213_v37 = vadd.s32 (!%p322_p11), %v212_v36, %v211_v35 }
 0x241   : > { %vm214_vm4 = vcmp.lt.s32.totalorder (!%p322_p11), %v213_v37, 13 }
 0x242   : > { %v215_v38 = vsel (!%p322_p11), %vm214_vm4, %v187_v25, 0.0 }
 0x243   : > { %v217_v39 = vsel (!%p322_p11), %vm216_vm3, %v215_v38, 0.0 }
 0x244   : > { %218 = vadd.xlane.f32.xlu0 (!%p322_p11), %v217_v39 }
 0x2d1   : > { %v219_v40 = vpop.xlane.xlu0 %218 }
 0x2d2   : > { %v220_v41 = vrot.slane %v219_v40, 4 }
 0x2d4   : > { %v221_v42 = vadd.f32 %v220_v41, %v219_v40 }
 0x2d6   : > { %v222_v43 = vrot.slane %v221_v42, 2 }
 0x2d8   : > { %v223_v44 = vadd.f32 %v222_v43, %v221_v42 }
 0x2da   : > { %v224_v45 = vrot.slane %v223_v44, 1 }
 0x2dc   : > { %v225_v46 = vadd.f32 %v224_v45, %v223_v44 }
 0x2de   : > { %330 = vpush %v225_v46 }
 0x30f   : > { %s331_s6 = spop %330 }
 0x310   : > { %v227_v47 = vstv %s331_s6 }
 0x311   : > { %228 = vst [vmem:[%s524_s3] sm:$0xff] %v227_v47 }
 0x312 PF: > { %s325_s7 = sshll.u32 %s481_s13, 7  ;;  %s243_s17 = sshll.u32 %s524_s3, 4  ;;  %s244_s17 = int_to_ptr.vmem [resolvable:$true] %s243_s17 }
 0x313   : > { %s536_s16 = scalar_lea.hbm %s577_s2, %s325_s7  ;;  %s230_s21 = scalar_lea.sflag [#allocation3], %s145_s29 }
 0x314   : > { %s379_s22 = scalar_lea.vmem %s244_s17, 128  ;;  %s444_s23 = smov [#allocation2]  }
 0x315   : > { %p380_p12 = scmp.ne.s32.totalorder %s244_s17, %s379_s22  ;;  %s383_s24 = sshll.u32 %s444_s23, 4  ;;  %s384_s24 = int_to_ptr.vmem [resolvable:$false] %s383_s24 }
 0x316   : > { %s385_s25 = scalar_lea.vmem %s384_s24, 256  ;;  %p386_p1 = scmp.lt.s32.totalorder %s244_s17, %s384_s24 }
 0x317   : > { %p381_p13 = pnand %p380_p12, %p500_p5  ;;  %p387_p2 = scmp.lt.s32.totalorder %s385_s25, %s379_s22 }
 0x319   : > { %p382_p0 = pneg %p381_p13  ;;  %p388_p3 = por %p387_p2, %p386_p1 }
 0x31b   : > { %p389_p4 = pnand %p388_p3, %p382_p0 }
 0x31d   : > { %392 = shalt.err (!%p389_p4)
}
 0x31e   : > { %s393_s13 = scalar_lea.hbm %s536_s16, 128  ;;  %s397_s28 = scalar_lea.hbm %s577_s2, 256 }
 0x31f   : > { %p394_p7 = scmp.ne.s32.totalorder %s536_s16, %s393_s13  ;;  %p398_p10 = scmp.lt.u32.totalorder %s536_s16, %s577_s2 }
 0x320   : > { %p399_p11 = scmp.lt.u32.totalorder %s397_s28, %s393_s13  ;;  %p401_p13 = scmp.lt.u32.totalorder %s393_s13, %s536_s16 }
 0x321   : > { %p395_p8 = pnand %p394_p7, %p500_p5 }
 0x322   : > { %p400_p12 = por %p399_p11, %p398_p10 }
 0x323   : > { %p396_p9 = pneg %p395_p8 }
 0x324   : > { %p402_p0 = por %p401_p13, %p400_p12 }
 0x326   : > { %p403_p1 = pnand %p402_p0, %p396_p9 }
 0x328   : > { %406 = shalt.err (!%p403_p1)
}
 0x329   : > { %332 = dma.vmem_to_hbm [thread:$0]  (%p500_p5), %s244_s17, 128, %s536_s16, %s230_s21  }
 0x32a PF: > { %p338_p2 = scmp.ge.s32.totalorder %s441_s12, 2  ;;  %s255_s3 = sand.u32 1, %s429_s9  }
 0x32b   : > { %s256_s4 = scalar_lea.sflag [#allocation3], %s255_s3 }
 0x32c   : > { %p335_p3 = pnand %p338_p2, %p504_p6 }
 0x32e   : > { %424 = dma.done.wait (!%p335_p3), %s256_s4, 128  }
 0x32f   : > { %426 = vsyncadd (!%p335_p3), %s256_s4, 4294967168  ;;  %p12_p4 = scmp.ge.s32.totalorder %s485_s15, 4   ;;  %s580_s9 = smov %s433_s10 }
 0x330   : > { %s581_s10 = smov %s437_s11  ;;  %s582_s11 = smov %s496_s18 }
 0x331   : > { %s583_s12 = smov %s485_s15  ;;  %14 = sbr.rel (!%p12_p4) target bundleno = 3 (0x3), region = 74 }
 0x338   :  { %261 = vsyncpa [#allocation3], 1 }
 0x339   :  { %263 = vsyncpa [#allocation3 + $0x1], 1 }

</bundles_post_ra>
